<compile_context>
chip_gen: v7x
topology: tpu7x:2x2x1
jax: 0.10.0
libtpu: 0.0.40
codegen_flags: <defaults>
</compile_context>

<pallas_src>
import functools

import jax
import jax.numpy as jnp
from jax.experimental import pallas as pl
from jax.experimental.pallas import tpu as pltpu

# ---- module hyper-parameters (small, structurally identical to the torch defaults) ----
SIGNAL_DIM = 16          # torch default: 50
N_FILTERS  = 8           # torch default: 8
N_LAYERS   = 3           # torch default: 3
INNER_DIM  = 32          # torch default: 125
KSIZE      = 3           # torch default: 3
UPSAMPLING = 4           # torch default: 8
KERNEL_OUT = 9           # torch default: 25

PAD     = KSIZE // 2                              # circular conv padding
CT_PAD  = (KERNEL_OUT - UPSAMPLING + 1) // 2      # conv-transpose padding
OUT_PAD = 1                                       # conv-transpose output_padding
IN_DIM  = 2 * SIGNAL_DIM
CL      = N_FILTERS * INNER_DIM                   # flattened channel*length width (lanes)
FR_SIZE = INNER_DIM * UPSAMPLING                  # conv-transpose output length
BN_EPS  = 1e-5

assert (INNER_DIM - 1) * UPSAMPLING - 2 * CT_PAD + KERNEL_OUT + OUT_PAD == FR_SIZE


def _round_up(x, m):
    return ((x + m - 1) // m) * m


# --------------------------------------------------------------------------------------
# Pallas kernel: one batch tile (TB samples) per grid step. All arguments but inp/out are
# grid-invariant weight blocks that live in VMEM across the pipeline.
# --------------------------------------------------------------------------------------
def fr_kernel(inp_ref, w_in_ref, conv_w_ref, bn_scale_ref, bn_shift_ref, ct_ref, out_ref):
    # in_layer: Linear(2S -> C*L, no bias), lane-dense output (TB, C*L).
    x = jnp.dot(inp_ref[...], w_in_ref[...], preferred_element_type=jnp.float32)

    # n_layers x [circular Conv1d (dense folded) -> BatchNorm1d (eval, folded) -> ReLU]
    for n in range(N_LAYERS):
        y = jnp.dot(x, conv_w_ref[n], preferred_element_type=jnp.float32)      # (TB, CL)
        y = y * bn_scale_ref[pl.ds(n, 1), :] + bn_shift_ref[pl.ds(n, 1), :]     # (1, CL) bcast
        x = jnp.maximum(y, 0.0)

    # out_layer: ConvTranspose1d(C -> 1) as one matmul against the scatter matrix.
    out = jnp.dot(x, ct_ref[...], preferred_element_type=jnp.float32)           # (TB, FR)
    out_ref[...] = out.astype(out_ref.dtype)


# --------------------------------------------------------------------------------------
# Plain-JAX glue: fold conv / BN / conv-transpose into dense matrices & lane vectors.
# --------------------------------------------------------------------------------------
def make_conv_matrix(w):
    """w: (C_out, C_in, K) circular-conv weight -> dense (C*L, C*L) matrix M such that
    y_flat = x_flat @ M reproduces Conv1d(..., padding_mode='circular'), where flat
    index = c*L + l."""
    C, L = N_FILTERS, INNER_DIM
    l_out = jnp.arange(L)
    M = jnp.zeros((C, L, C, L), jnp.float32)          # [c_in, l_in, c_out, l_out]
    for k in range(KSIZE):
        l_in = (l_out + k - PAD) % L                                   # (L,)
        onehot = (jnp.arange(L)[:, None] == l_in[None, :]).astype(jnp.float32)  # (L_in, L_out)
        wk = w[:, :, k].astype(jnp.float32)                            # (C_out, C_in)
        M = M + wk.T[:, None, :, None] * onehot[None, :, None, :]
    return M.reshape(C * L, C * L)


def make_ct_matrix(w_ct):
    """w_ct: (C, 1, KERNEL_OUT) ConvTranspose1d weight -> (C*L, FR_SIZE) scatter matrix.

    M[c*L + l, j] = w_ct[c, 0, j + CT_PAD - l*UPSAMPLING] if that tap index is valid else 0,
    so out[j] = sum_{c,l} x[c,l] * M[c*L+l, j] (includes padding / output_padding crop)."""
    C, L = N_FILTERS, INNER_DIM
    l_idx = jnp.arange(L)[:, None]                       # (L, 1)
    j_idx = jnp.arange(FR_SIZE)[None, :]                 # (1, FR)
    k_idx = j_idx + CT_PAD - l_idx * UPSAMPLING          # (L, FR)
    valid = (k_idx >= 0) & (k_idx < KERNEL_OUT)
    k_c = jnp.clip(k_idx, 0, KERNEL_OUT - 1)
    taps = w_ct[:, 0, :].astype(jnp.float32)             # (C, K)
    M = jnp.where(valid[None, :, :], taps[:, k_c], 0.0)  # (C, L, FR)
    return M.reshape(C * L, FR_SIZE)


@functools.partial(jax.jit, static_argnames=("batch_tile",))
def fr_forward(inp, params, batch_tile=128):
    """inp: (B, 2, SIGNAL_DIM) float32 -> (B, FR_SIZE) float32."""
    w_in, conv_ws, bn_gamma, bn_beta, bn_mean, bn_var, w_ct = params
    B = inp.shape[0]

    inp_flat = inp.reshape(B, IN_DIM).astype(jnp.float32)     # torch .view(bsz, -1)

    # Batch tile: multiple of 8 sublanes; pad the batch so the grid divides evenly.
    # (Pick batch_tile=128 for v5e, 256 for v6e/v7x when B is large; keep >=2 grid steps
    #  for v7x's second TensorCore.)
    tb = min(batch_tile, _round_up(B, 8))
    b_pad = _round_up(B, tb)
    if b_pad != B:
        inp_flat = jnp.pad(inp_flat, ((0, b_pad - B), (0, 0)))

    # --- parameter prep (glue, traced once per shape) ---
    # Linear weight (C*L, 2S) -> (2S, C*L); flat output index is already c*L + l.
    w_in_t = w_in.astype(jnp.float32).T                                   # (2S, CL)
    conv_mats = jnp.stack([make_conv_matrix(conv_ws[n]) for n in range(N_LAYERS)])  # (NL, CL, CL)
    scale = bn_gamma / jnp.sqrt(bn_var + BN_EPS)                          # (NL, C)
    shift = bn_beta - bn_mean * scale
    bn_scale = jnp.repeat(scale, INNER_DIM, axis=1).astype(jnp.float32)   # (NL, CL)
    bn_shift = jnp.repeat(shift, INNER_DIM, axis=1).astype(jnp.float32)   # (NL, CL)
    ct_mat = make_ct_matrix(w_ct)                                         # (CL, FR)

    out = pl.pallas_call(
        fr_kernel,
        out_shape=jax.ShapeDtypeStruct((b_pad, FR_SIZE), jnp.float32),
        grid=(b_pad // tb,),
        in_specs=[
            pl.BlockSpec((tb, IN_DIM), lambda b: (b, 0)),
            pl.BlockSpec((IN_DIM, CL), lambda b: (0, 0)),
            pl.BlockSpec((N_LAYERS, CL, CL), lambda b: (0, 0, 0)),
            pl.BlockSpec((N_LAYERS, CL), lambda b: (0, 0)),
            pl.BlockSpec((N_LAYERS, CL), lambda b: (0, 0)),
            pl.BlockSpec((CL, FR_SIZE), lambda b: (0, 0)),
        ],
        out_specs=pl.BlockSpec((tb, FR_SIZE), lambda b: (b, 0)),
        compiler_params=pltpu.CompilerParams(dimension_semantics=("parallel",)),
    )(inp_flat, w_in_t, conv_mats, bn_scale, bn_shift, ct_mat)
    return out[:B]


# --------------------------------------------------------------------------------------
# Pure-JAX reference (independent formulation) for validation.
# --------------------------------------------------------------------------------------
def fr_reference(inp, params):
    w_in, conv_ws, bn_gamma, bn_beta, bn_mean, bn_var, w_ct = params
    B = inp.shape[0]
    C, L = N_FILTERS, INNER_DIM
    hp = jax.lax.Precision.HIGHEST

    x = jnp.matmul(inp.reshape(B, IN_DIM), w_in.T, precision=hp)     # (B, C*L)
    x = x.reshape(B, C, L)
    for n in range(N_LAYERS):
        xp = jnp.concatenate([x[..., L - PAD:], x, x[..., :PAD]], axis=-1)   # circular pad
        y = jnp.zeros((B, C, L), jnp.float32)
        for k in range(KSIZE):
            y = y + jnp.einsum('oi,bil->bol', conv_ws[n][:, :, k], xp[..., k:k + L],
                               precision=hp)
        scale = bn_gamma[n] / jnp.sqrt(bn_var[n] + BN_EPS)
        shift = bn_beta[n] - bn_mean[n] * scale
        y = y * scale[None, :, None] + shift[None, :, None]
        x = jnp.maximum(y, 0.0)

    # ConvTranspose1d: scatter-add taps on the full (uncropped) axis, then crop padding.
    full_len = (L - 1) * UPSAMPLING + KERNEL_OUT
    y_full = jnp.zeros((B, full_len), jnp.float32)
    for k in range(KERNEL_OUT):
        contrib = jnp.einsum('bcl,c->bl', x, w_ct[:, 0, k], precision=hp)    # (B, L)
        y_full = y_full.at[:, k:k + (L - 1) * UPSAMPLING + 1:UPSAMPLING].add(contrib)
    return y_full[:, CT_PAD:CT_PAD + FR_SIZE]


# --------------------------------------------------------------------------------------
if __name__ == "__main__":
    key = jax.random.PRNGKey(0)
    k_inp, k_win, k_conv, k_g, k_b, k_m, k_v, k_ct = jax.random.split(key, 8)

    B = 2
    inp = jax.random.normal(k_inp, (B, 2, SIGNAL_DIM), jnp.float32)

    # Deterministic synthetic parameters (shapes follow the torch module __init__).
    w_in    = 0.1 * jax.random.normal(k_win, (N_FILTERS * INNER_DIM, IN_DIM), jnp.float32)
    conv_ws = 0.2 * jax.random.normal(k_conv, (N_LAYERS, N_FILTERS, N_FILTERS, KSIZE), jnp.float32)
    bn_gamma = 1.0 + 0.1 * jax.random.normal(k_g, (N_LAYERS, N_FILTERS), jnp.float32)
    bn_beta  = 0.1 * jax.random.normal(k_b, (N_LAYERS, N_FILTERS), jnp.float32)
    bn_mean  = 0.1 * jax.random.normal(k_m, (N_LAYERS, N_FILTERS), jnp.float32)
    bn_var   = jax.random.uniform(k_v, (N_LAYERS, N_FILTERS), jnp.float32, 0.5, 1.5)
    w_ct     = 0.2 * jax.random.normal(k_ct, (N_FILTERS, 1, KERNEL_OUT), jnp.float32)
    params = (w_in, conv_ws, bn_gamma, bn_beta, bn_mean, bn_var, w_ct)

    out = fr_forward(inp, params)
    out = jax.block_until_ready(out)
    assert out.shape == (B, FR_SIZE), out.shape

    ref = fr_reference(inp, params)
    max_err = float(jnp.max(jnp.abs(out - ref)))
    if not bool(jnp.allclose(out, ref, rtol=1e-2, atol=1e-2)):
        raise AssertionError(f"kernel/reference mismatch, max abs err = {max_err}")

    print("KERNEL_OK")
</pallas_src>

<mosaic_0001>
module attributes {stable_mosaic.version = 11 : i64} {
  func.func @fr_kernel(%arg0: i32, %arg1: memref<8x32xf32, #tpu.memory_space<vmem>>, %arg2: memref<32x256xf32, #tpu.memory_space<vmem>>, %arg3: memref<3x256x256xf32, #tpu.memory_space<vmem>>, %arg4: memref<3x256xf32, #tpu.memory_space<vmem>>, %arg5: memref<3x256xf32, #tpu.memory_space<vmem>>, %arg6: memref<256x128xf32, #tpu.memory_space<vmem>>, %arg7: memref<8x128xf32, #tpu.memory_space<vmem>>) attributes {dimension_semantics = [#tpu.dimension_semantics<parallel>], iteration_bounds = array<i64: 1>, scalar_prefetch = 0 : i64, scratch_operands = 0 : i64, tpu.core_type = #tpu.core_type<tc>, window_params = [{transform_indices = @transform_0, window_bounds = array<i64: 8, 32>}, {pipeline_mode = #tpu.pipeline_mode<synchronous>, transform_indices = @transform_1, window_bounds = array<i64: 32, 256>}, {pipeline_mode = #tpu.pipeline_mode<synchronous>, transform_indices = @transform_2, window_bounds = array<i64: 3, 256, 256>}, {pipeline_mode = #tpu.pipeline_mode<synchronous>, transform_indices = @transform_3, window_bounds = array<i64: 3, 256>}, {pipeline_mode = #tpu.pipeline_mode<synchronous>, transform_indices = @transform_4, window_bounds = array<i64: 3, 256>}, {pipeline_mode = #tpu.pipeline_mode<synchronous>, transform_indices = @transform_5, window_bounds = array<i64: 256, 128>}, {transform_indices = @transform_6, window_bounds = array<i64: 8, 128>}]} {
    %c0 = arith.constant 0 : index
    %c0_0 = arith.constant 0 : index
    %0 = vector.load %arg1[%c0, %c0_0] : memref<8x32xf32, #tpu.memory_space<vmem>>, vector<8x32xf32>
    %c0_1 = arith.constant 0 : index
    %c0_2 = arith.constant 0 : index
    %1 = vector.load %arg2[%c0_1, %c0_2] : memref<32x256xf32, #tpu.memory_space<vmem>>, vector<32x256xf32>
    %cst = arith.constant dense<0.000000e+00> : vector<8x256xf32>
    %2 = tpu.matmul %0, %1, %cst {dimension_numbers = #tpu.dot_dimension_numbers<[1], [0], [0], [1], [0, 0, 1, 1], [], []>} : vector<8x32xf32>, vector<32x256xf32>, vector<8x256xf32> -> vector<8x256xf32>
    %c0_3 = arith.constant 0 : index
    %c0_4 = arith.constant 0 : index
    %c0_5 = arith.constant 0 : index
    %3 = vector.load %arg3[%c0_3, %c0_4, %c0_5] : memref<3x256x256xf32, #tpu.memory_space<vmem>>, vector<1x256x256xf32>
    %4 = vector.shape_cast %3 : vector<1x256x256xf32> to vector<256x256xf32>
    %cst_6 = arith.constant dense<0.000000e+00> : vector<8x256xf32>
    %5 = tpu.matmul %2, %4, %cst_6 {dimension_numbers = #tpu.dot_dimension_numbers<[1], [0], [0], [1], [0, 0, 1, 1], [], []>} : vector<8x256xf32>, vector<256x256xf32>, vector<8x256xf32> -> vector<8x256xf32>
    %c0_7 = arith.constant 0 : index
    %c0_8 = arith.constant 0 : index
    %6 = vector.load %arg4[%c0_7, %c0_8] : memref<3x256xf32, #tpu.memory_space<vmem>>, vector<1x256xf32>
    %7 = vector.broadcast %6 : vector<1x256xf32> to vector<8x256xf32>
    %8 = arith.mulf %5, %7 : vector<8x256xf32>
    %c0_9 = arith.constant 0 : index
    %c0_10 = arith.constant 0 : index
    %9 = vector.load %arg5[%c0_9, %c0_10] : memref<3x256xf32, #tpu.memory_space<vmem>>, vector<1x256xf32>
    %10 = vector.broadcast %9 : vector<1x256xf32> to vector<8x256xf32>
    %11 = arith.addf %8, %10 : vector<8x256xf32>
    %cst_11 = arith.constant 0.000000e+00 : f32
    %12 = vector.broadcast %cst_11 : f32 to vector<8x256xf32>
    %13 = arith.maximumf %11, %12 : vector<8x256xf32>
    %c1 = arith.constant 1 : index
    %c0_12 = arith.constant 0 : index
    %c0_13 = arith.constant 0 : index
    %14 = vector.load %arg3[%c1, %c0_12, %c0_13] : memref<3x256x256xf32, #tpu.memory_space<vmem>>, vector<1x256x256xf32>
    %15 = vector.shape_cast %14 : vector<1x256x256xf32> to vector<256x256xf32>
    %cst_14 = arith.constant dense<0.000000e+00> : vector<8x256xf32>
    %16 = tpu.matmul %13, %15, %cst_14 {dimension_numbers = #tpu.dot_dimension_numbers<[1], [0], [0], [1], [0, 0, 1, 1], [], []>} : vector<8x256xf32>, vector<256x256xf32>, vector<8x256xf32> -> vector<8x256xf32>
    %c1_15 = arith.constant 1 : index
    %c0_16 = arith.constant 0 : index
    %17 = vector.load %arg4[%c1_15, %c0_16] : memref<3x256xf32, #tpu.memory_space<vmem>>, vector<1x256xf32>
    %18 = vector.broadcast %17 : vector<1x256xf32> to vector<8x256xf32>
    %19 = arith.mulf %16, %18 : vector<8x256xf32>
    %c1_17 = arith.constant 1 : index
    %c0_18 = arith.constant 0 : index
    %20 = vector.load %arg5[%c1_17, %c0_18] : memref<3x256xf32, #tpu.memory_space<vmem>>, vector<1x256xf32>
    %21 = vector.broadcast %20 : vector<1x256xf32> to vector<8x256xf32>
    %22 = arith.addf %19, %21 : vector<8x256xf32>
    %cst_19 = arith.constant 0.000000e+00 : f32
    %23 = vector.broadcast %cst_19 : f32 to vector<8x256xf32>
    %24 = arith.maximumf %22, %23 : vector<8x256xf32>
    %c2 = arith.constant 2 : index
    %c0_20 = arith.constant 0 : index
    %c0_21 = arith.constant 0 : index
    %25 = vector.load %arg3[%c2, %c0_20, %c0_21] : memref<3x256x256xf32, #tpu.memory_space<vmem>>, vector<1x256x256xf32>
    %26 = vector.shape_cast %25 : vector<1x256x256xf32> to vector<256x256xf32>
    %cst_22 = arith.constant dense<0.000000e+00> : vector<8x256xf32>
    %27 = tpu.matmul %24, %26, %cst_22 {dimension_numbers = #tpu.dot_dimension_numbers<[1], [0], [0], [1], [0, 0, 1, 1], [], []>} : vector<8x256xf32>, vector<256x256xf32>, vector<8x256xf32> -> vector<8x256xf32>
    %c2_23 = arith.constant 2 : index
    %c0_24 = arith.constant 0 : index
    %28 = vector.load %arg4[%c2_23, %c0_24] : memref<3x256xf32, #tpu.memory_space<vmem>>, vector<1x256xf32>
    %29 = vector.broadcast %28 : vector<1x256xf32> to vector<8x256xf32>
    %30 = arith.mulf %27, %29 : vector<8x256xf32>
    %c2_25 = arith.constant 2 : index
    %c0_26 = arith.constant 0 : index
    %31 = vector.load %arg5[%c2_25, %c0_26] : memref<3x256xf32, #tpu.memory_space<vmem>>, vector<1x256xf32>
    %32 = vector.broadcast %31 : vector<1x256xf32> to vector<8x256xf32>
    %33 = arith.addf %30, %32 : vector<8x256xf32>
    %cst_27 = arith.constant 0.000000e+00 : f32
    %34 = vector.broadcast %cst_27 : f32 to vector<8x256xf32>
    %35 = arith.maximumf %33, %34 : vector<8x256xf32>
    %c0_28 = arith.constant 0 : index
    %c0_29 = arith.constant 0 : index
    %36 = vector.load %arg6[%c0_28, %c0_29] : memref<256x128xf32, #tpu.memory_space<vmem>>, vector<256x128xf32>
    %cst_30 = arith.constant dense<0.000000e+00> : vector<8x128xf32>
    %37 = tpu.matmul %35, %36, %cst_30 {dimension_numbers = #tpu.dot_dimension_numbers<[1], [0], [0], [1], [0, 0, 1, 1], [], []>} : vector<8x256xf32>, vector<256x128xf32>, vector<8x128xf32> -> vector<8x128xf32>
    %c0_31 = arith.constant 0 : index
    %c0_32 = arith.constant 0 : index
    %38 = vector.load %arg7[%c0_31, %c0_32] : memref<8x128xf32, #tpu.memory_space<vmem>>, vector<8x128xf32>
    tpu.vector_store %arg7[%c0_31, %c0_32], %37 {strides = array<i32>} : memref<8x128xf32, #tpu.memory_space<vmem>>, vector<8x128xf32>,
    return
  }
  func.func @transform_0(%arg0: i32) -> (i32, i32) {
    %c0_i32 = arith.constant 0 : i32
    %c0_i32_0 = arith.constant 0 : i32
    return %arg0, %c0_i32 : i32, i32
  }
  func.func @transform_1(%arg0: i32) -> (i32, i32) {
    %c0_i32 = arith.constant 0 : i32
    %c0_i32_0 = arith.constant 0 : i32
    %c0_i32_1 = arith.constant 0 : i32
    return %c0_i32, %c0_i32_0 : i32, i32
  }
  func.func @transform_2(%arg0: i32) -> (i32, i32, i32) {
    %c0_i32 = arith.constant 0 : i32
    %c0_i32_0 = arith.constant 0 : i32
    %c0_i32_1 = arith.constant 0 : i32
    %c0_i32_2 = arith.constant 0 : i32
    return %c0_i32, %c0_i32_0, %c0_i32_1 : i32, i32, i32
  }
  func.func @transform_3(%arg0: i32) -> (i32, i32) {
    %c0_i32 = arith.constant 0 : i32
    %c0_i32_0 = arith.constant 0 : i32
    %c0_i32_1 = arith.constant 0 : i32
    return %c0_i32, %c0_i32_0 : i32, i32
  }
  func.func @transform_4(%arg0: i32) -> (i32, i32) {
    %c0_i32 = arith.constant 0 : i32
    %c0_i32_0 = arith.constant 0 : i32
    %c0_i32_1 = arith.constant 0 : i32
    return %c0_i32, %c0_i32_0 : i32, i32
  }
  func.func @transform_5(%arg0: i32) -> (i32, i32) {
    %c0_i32 = arith.constant 0 : i32
    %c0_i32_0 = arith.constant 0 : i32
    %c0_i32_1 = arith.constant 0 : i32
    return %c0_i32, %c0_i32_0 : i32, i32
  }
  func.func @transform_6(%arg0: i32) -> (i32, i32) {
    %c0_i32 = arith.constant 0 : i32
    %c0_i32_0 = arith.constant 0 : i32
    return %arg0, %c0_i32 : i32, i32
  }
}

</mosaic_0001>

<bundles_post_ra>
// kernel: fr_forward.1
= control target key start
LH: loop header
LB: loop body
LE: loop exit
PB: predicated region body
PF: predicated region fallthrough
CT: control target
= control target key end

     0   :  { %v1116_v3 = vmov 0.0   ;;  %vm32_vm0 = vcmask 261120   ;;  %s1888_s1 = inlined_call_operand.vmem [shape: f32[32,256], index: 1, kind: input, shape index: {}]   ;;  %s1889_s2 = inlined_call_operand.vmem [shape: f32[3,256,256], index: 2, kind: input, shape index: {}]   ;;  %s1890_s0 = inlined_call_operand.vmem [shape: f32[8,32], index: 0, kind: input, shape index: {}]   ;;  %s1891_s3 = inlined_call_operand.vmem [shape: f32[3,256], index: 3, kind: input, shape index: {}]   ;;  %s1892_s4 = inlined_call_operand.vmem [shape: f32[3,256], index: 4, kind: input, shape index: {}]   ;;  %s1893_s5 = inlined_call_operand.vmem [shape: f32[256,128], index: 5, kind: input, shape index: {}]   ;;  %s1894_s6 = inlined_call_operand.vmem [shape: f32[8,128], index: 6, kind: output, shape index: {}]  }
   0x1   :  { %v25_v0 = vld [vmem:[%s1888_s1 + $0x8] sm:$0xff]  ;;  %v27_v1 = vld [vmem:[%s1888_s1 + $0x18] sm:$0xff]  ;;  %v24_v2 = vld [vmem:[%s1888_s1] sm:$0xff]  ;;  %100 = vmatprep.mubr.f32.mxu0 %v1116_v3 }
   0x2   :  { %v883_v4 = vpack.c.bf16 %v27_v1, %v25_v0  ;;  %v26_v5 = vld [vmem:[%s1888_s1 + $0x10] sm:$0xff]  ;;  %v29_v6 = vld [vmem:[%s1888_s1 + $0x28] sm:$0xff]  ;;  %v31_v7 = vld [vmem:[%s1888_s1 + $0x38] sm:$0xff] }
   0x3   :  { %v885_v8 = vpack.c.bf16 %v26_v5, %v24_v2  ;;  %v887_v9 = vpack.c.bf16 %v31_v7, %v29_v6  ;;  %v28_v10 = vld [vmem:[%s1888_s1 + $0x20] sm:$0xff]  ;;  %v30_v11 = vld [vmem:[%s1888_s1 + $0x30] sm:$0xff]  ;;  %v108_v12 = vld [vmem:[%s1889_s2 + $0x8] sm:$0xff] }
   0x4   :  { %884 = vmatprep.subr.bf16.mxu0 %v883_v4  ;;  %v110_v13 = vld [vmem:[%s1889_s2 + $0x18] sm:$0xff]  ;;  %v107_v14 = vld [vmem:[%s1889_s2] sm:$0xff]  ;;  %v889_v15 = vpack.c.bf16 %v30_v11, %v28_v10  ;;  %v109_v17 = vld [vmem:[%s1889_s2 + $0x10] sm:$0xff] }
   0x5   :  { %886 = vmatpush1.bf16.msra.mxu0 %v885_v8  ;;  %v891_v16 = vpack.c.bf16 %v110_v13, %v108_v12  ;;  %v112_v18 = vld [vmem:[%s1889_s2 + $0x28] sm:$0xff]  ;;  %v114_v19 = vld [vmem:[%s1889_s2 + $0x38] sm:$0xff]  ;;  %v893_v20 = vpack.c.bf16 %v109_v17, %v107_v14  ;;  %v111_v22 = vld [vmem:[%s1889_s2 + $0x20] sm:$0xff] }
   0x6   :  { %888 = vmatprep.subr.bf16.mxu0 %v887_v9  ;;  %v895_v21 = vpack.c.bf16 %v114_v19, %v112_v18  ;;  %v113_v23 = vld [vmem:[%s1889_s2 + $0x30] sm:$0xff]  ;;  %v116_v24 = vld [vmem:[%s1889_s2 + $0x48] sm:$0xff]  ;;  %v118_v25 = vld [vmem:[%s1889_s2 + $0x58] sm:$0xff] }
   0x7   :  { %892 = vmatprep.subr.bf16.mxu1 %v891_v16  ;;  %v897_v26 = vpack.c.bf16 %v113_v23, %v111_v22  ;;  %v23_v27 = vld [vmem:[%s1890_s0] sm:$0xff]  ;;  %v899_v28 = vpack.c.bf16 %v118_v25, %v116_v24  ;;  %v117_v30 = vld [vmem:[%s1889_s2 + $0x50] sm:$0xff]  ;;  %v120_v31 = vld [vmem:[%s1889_s2 + $0x68] sm:$0xff] }
   0x8   :  { %894 = vmatpush1.bf16.msra.mxu1 %v893_v20  ;;  %v115_v29 = vld [vmem:[%s1889_s2 + $0x40] sm:$0xff]  ;;  %v122_v32 = vld [vmem:[%s1889_s2 + $0x78] sm:$0xff]  ;;  %v121_v36 = vld [vmem:[%s1889_s2 + $0x70] sm:$0xff] }
   0x9   :  { %890 = vmatpush1.bf16.msra.mxu0 %v889_v15  ;;  %896 = vmatprep.subr.bf16.mxu1 %v895_v21  ;;  %v901_v33 = vpack.c.bf16 %v117_v30, %v115_v29  ;;  %v903_v34 = vpack.c.bf16 %v122_v32, %v120_v31  ;;  %v119_v35 = vld [vmem:[%s1889_s2 + $0x60] sm:$0xff]  ;;  %v124_v37 = vld [vmem:[%s1889_s2 + $0x88] sm:$0xff]  ;;  %v126_v38 = vld [vmem:[%s1889_s2 + $0x98] sm:$0xff] }
   0xa   :  { %v905_v39 = vpack.c.bf16 %v121_v36, %v119_v35  ;;  %v907_v40 = vpack.c.bf16 %v126_v38, %v124_v37  ;;  %v123_v41 = vld [vmem:[%s1889_s2 + $0x80] sm:$0xff]  ;;  %v125_v42 = vld [vmem:[%s1889_s2 + $0x90] sm:$0xff]  ;;  %v128_v43 = vld [vmem:[%s1889_s2 + $0xa8] sm:$0xff] }
   0xb   :  { %v130_v44 = vld [vmem:[%s1889_s2 + $0xb8] sm:$0xff]  ;;  %v909_v45 = vpack.c.bf16 %v125_v42, %v123_v41  ;;  %v127_v47 = vld [vmem:[%s1889_s2 + $0xa0] sm:$0xff]  ;;  %v129_v48 = vld [vmem:[%s1889_s2 + $0xb0] sm:$0xff] }
   0xc   :  { %715 = vmatmul.mubr.msk.f32.vlgmr.msra.gmra.mrb[0].mxu0 %vm32_vm0, %v23_v27  ;;  %898 = vmatpush1.bf16.msra.mxu1 %v897_v26  ;;  %v911_v46 = vpack.c.bf16 %v130_v44, %v128_v43  ;;  %v132_v49 = vld [vmem:[%s1889_s2 + $0xc8] sm:$0xff]  ;;  %v134_v50 = vld [vmem:[%s1889_s2 + $0xd8] sm:$0xff]  ;;  %v913_v51 = vpack.c.bf16 %v129_v48, %v127_v47  ;;  %v131_v53 = vld [vmem:[%s1889_s2 + $0xc0] sm:$0xff] }
   0xd   :  { %900 = vmatprep.subr.bf16.mxu1 %v899_v28  ;;  %v915_v52 = vpack.c.bf16 %v134_v50, %v132_v49  ;;  %v133_v54 = vld [vmem:[%s1889_s2 + $0xd0] sm:$0xff]  ;;  %v136_v55 = vld [vmem:[%s1889_s2 + $0xe8] sm:$0xff]  ;;  %v138_v56 = vld [vmem:[%s1889_s2 + $0xf8] sm:$0xff] }
   0xe   :  { %v917_v57 = vpack.c.bf16 %v133_v54, %v131_v53  ;;  %v919_v58 = vpack.c.bf16 %v138_v56, %v136_v55  ;;  %v135_v59 = vld [vmem:[%s1889_s2 + $0xe0] sm:$0xff]  ;;  %v137_v60 = vld [vmem:[%s1889_s2 + $0xf0] sm:$0xff]  ;;  %v140_v61 = vld [vmem:[%s1889_s2 + $0x108] sm:$0xff] }
   0xf   :  { %v142_v62 = vld [vmem:[%s1889_s2 + $0x118] sm:$0xff]  ;;  %v921_v63 = vpack.c.bf16 %v137_v60, %v135_v59  ;;  %v139_v1 = vld [vmem:[%s1889_s2 + $0x100] sm:$0xff]  ;;  %v141_v2 = vld [vmem:[%s1889_s2 + $0x110] sm:$0xff] }
  0x10   :  { %902 = vmatpush1.bf16.msra.mxu1 %v901_v33  ;;  %v923_v0 = vpack.c.bf16 %v142_v62, %v140_v61  ;;  %v144_v3 = vld [vmem:[%s1889_s2 + $0x128] sm:$0xff]  ;;  %v146_v4 = vld [vmem:[%s1889_s2 + $0x138] sm:$0xff]  ;;  %v925_v5 = vpack.c.bf16 %v141_v2, %v139_v1  ;;  %v143_v7 = vld [vmem:[%s1889_s2 + $0x120] sm:$0xff] }
  0x11   :  { %904 = vmatprep.subr.bf16.mxu1 %v903_v34  ;;  %v927_v6 = vpack.c.bf16 %v146_v4, %v144_v3  ;;  %v145_v8 = vld [vmem:[%s1889_s2 + $0x130] sm:$0xff]  ;;  %v148_v9 = vld [vmem:[%s1889_s2 + $0x148] sm:$0xff]  ;;  %v150_v10 = vld [vmem:[%s1889_s2 + $0x158] sm:$0xff] }
  0x12   :  { %v929_v11 = vpack.c.bf16 %v145_v8, %v143_v7  ;;  %v931_v12 = vpack.c.bf16 %v150_v10, %v148_v9  ;;  %v147_v13 = vld [vmem:[%s1889_s2 + $0x140] sm:$0xff]  ;;  %v149_v14 = vld [vmem:[%s1889_s2 + $0x150] sm:$0xff]  ;;  %v152_v15 = vld [vmem:[%s1889_s2 + $0x168] sm:$0xff] }
  0x13   :  { %v154_v16 = vld [vmem:[%s1889_s2 + $0x178] sm:$0xff]  ;;  %v933_v17 = vpack.c.bf16 %v149_v14, %v147_v13  ;;  %v151_v19 = vld [vmem:[%s1889_s2 + $0x160] sm:$0xff]  ;;  %v153_v20 = vld [vmem:[%s1889_s2 + $0x170] sm:$0xff] }
  0x14   :  { %906 = vmatpush1.bf16.msra.mxu1 %v905_v39  ;;  %v935_v18 = vpack.c.bf16 %v154_v16, %v152_v15  ;;  %v156_v21 = vld [vmem:[%s1889_s2 + $0x188] sm:$0xff]  ;;  %v158_v22 = vld [vmem:[%s1889_s2 + $0x198] sm:$0xff]  ;;  %v937_v23 = vpack.c.bf16 %v153_v20, %v151_v19  ;;  %v155_v25 = vld [vmem:[%s1889_s2 + $0x180] sm:$0xff] }
  0x15   :  { %908 = vmatprep.subr.bf16.mxu1 %v907_v40  ;;  %v939_v24 = vpack.c.bf16 %v158_v22, %v156_v21  ;;  %v157_v26 = vld [vmem:[%s1889_s2 + $0x190] sm:$0xff]  ;;  %v160_v27 = vld [vmem:[%s1889_s2 + $0x1a8] sm:$0xff]  ;;  %v162_v28 = vld [vmem:[%s1889_s2 + $0x1b8] sm:$0xff] }
  0x16   :  { %v941_v29 = vpack.c.bf16 %v157_v26, %v155_v25  ;;  %v943_v30 = vpack.c.bf16 %v162_v28, %v160_v27  ;;  %v159_v31 = vld [vmem:[%s1889_s2 + $0x1a0] sm:$0xff]  ;;  %v161_v32 = vld [vmem:[%s1889_s2 + $0x1b0] sm:$0xff]  ;;  %v164_v33 = vld [vmem:[%s1889_s2 + $0x1c8] sm:$0xff] }
  0x17   :  { %v166_v34 = vld [vmem:[%s1889_s2 + $0x1d8] sm:$0xff]  ;;  %v945_v35 = vpack.c.bf16 %v161_v32, %v159_v31  ;;  %v163_v37 = vld [vmem:[%s1889_s2 + $0x1c0] sm:$0xff]  ;;  %v165_v38 = vld [vmem:[%s1889_s2 + $0x1d0] sm:$0xff] }
  0x18   :  { %910 = vmatpush1.bf16.msra.mxu1 %v909_v45  ;;  %v947_v36 = vpack.c.bf16 %v166_v34, %v164_v33  ;;  %v168_v39 = vld [vmem:[%s1889_s2 + $0x1e8] sm:$0xff]  ;;  %v170_v40 = vld [vmem:[%s1889_s2 + $0x1f8] sm:$0xff]  ;;  %v949_v41 = vpack.c.bf16 %v165_v38, %v163_v37  ;;  %v167_v43 = vld [vmem:[%s1889_s2 + $0x1e0] sm:$0xff] }
  0x19   :  { %912 = vmatprep.subr.bf16.mxu1 %v911_v46  ;;  %v951_v42 = vpack.c.bf16 %v170_v40, %v168_v39  ;;  %v169_v44 = vld [vmem:[%s1889_s2 + $0x1f0] sm:$0xff]  ;;  %v717_v46 = vld [vmem:[%s1889_s2 + $0x208] sm:$0xff]  ;;  %v719_v47 = vld [vmem:[%s1889_s2 + $0x218] sm:$0xff] }
  0x1a   :  { %v953_v45 = vpack.c.bf16 %v169_v44, %v167_v43  ;;  %v716_v48 = vld [vmem:[%s1889_s2 + $0x200] sm:$0xff]  ;;  %v955_v49 = vpack.c.bf16 %v719_v47, %v717_v46  ;;  %v718_v50 = vld [vmem:[%s1889_s2 + $0x210] sm:$0xff]  ;;  %v761_v47 = vld [vmem:[%s1889_s2 + $0x368] sm:$0xff] }
  0x1b   :  { %v957_v53 = vpack.c.bf16 %v718_v50, %v716_v48  ;;  %v720_v55 = vld [vmem:[%s1889_s2 + $0x220] sm:$0xff]  ;;  %v722_v56 = vld [vmem:[%s1889_s2 + $0x230] sm:$0xff]  ;;  %v763_v48 = vld [vmem:[%s1889_s2 + $0x378] sm:$0xff] }
  0x1c   :  { %914 = vmatpush1.bf16.msra.mxu1 %v913_v51  ;;  %v721_v51 = vld [vmem:[%s1889_s2 + $0x228] sm:$0xff]  ;;  %956 = vmatprep.subr.bf16.mxu0 %v955_v49  ;;  %v961_v59 = vpack.c.bf16 %v722_v56, %v720_v55  ;;  %v724_v61 = vld [vmem:[%s1889_s2 + $0x240] sm:$0xff]  ;;  %v726_v62 = vld [vmem:[%s1889_s2 + $0x250] sm:$0xff]  ;;  %v999_v50 = vpack.c.bf16 %v763_v48, %v761_v47 }
  0x1d   :  { %916 = vmatprep.subr.bf16.mxu1 %v915_v52  ;;  %v723_v52 = vld [vmem:[%s1889_s2 + $0x238] sm:$0xff]  ;;  %958 = vmatpush1.bf16.msra.mxu0 %v957_v53  ;;  %v965_v1 = vpack.c.bf16 %v726_v62, %v724_v61  ;;  %v728_v3 = vld [vmem:[%s1889_s2 + $0x260] sm:$0xff]  ;;  %v730_v4 = vld [vmem:[%s1889_s2 + $0x270] sm:$0xff] }
  0x1e   :  { %v959_v54 = vpack.c.bf16 %v723_v52, %v721_v51  ;;  %v969_v7 = vpack.c.bf16 %v730_v4, %v728_v3  ;;  %v732_v9 = vld [vmem:[%s1889_s2 + $0x280] sm:$0xff]  ;;  %v734_v10 = vld [vmem:[%s1889_s2 + $0x290] sm:$0xff]  ;;  %v765_v53 = vld [vmem:[%s1889_s2 + $0x388] sm:$0xff] }
  0x1f   :  { %v973_v13 = vpack.c.bf16 %v734_v10, %v732_v9  ;;  %v736_v15 = vld [vmem:[%s1889_s2 + $0x2a0] sm:$0xff]  ;;  %v738_v16 = vld [vmem:[%s1889_s2 + $0x2b0] sm:$0xff]  ;;  %v773_v4 = vld [vmem:[%s1889_s2 + $0x3c8] sm:$0xff] }
  0x20   :  { %918 = vmatpush1.bf16.msra.mxu1 %v917_v57  ;;  %v725_v57 = vld [vmem:[%s1889_s2 + $0x248] sm:$0xff]  ;;  %960 = vmatprep.subr.bf16.mxu0 %v959_v54  ;;  %v977_v19 = vpack.c.bf16 %v738_v16, %v736_v15  ;;  %v740_v21 = vld [vmem:[%s1889_s2 + $0x2c0] sm:$0xff]  ;;  %v742_v22 = vld [vmem:[%s1889_s2 + $0x2d0] sm:$0xff] }
  0x21   :  { %920 = vmatprep.subr.bf16.mxu1 %v919_v58  ;;  %v727_v58 = vld [vmem:[%s1889_s2 + $0x258] sm:$0xff]  ;;  %962 = vmatpush1.bf16.msra.mxu0 %v961_v59  ;;  %v981_v25 = vpack.c.bf16 %v742_v22, %v740_v21  ;;  %v744_v27 = vld [vmem:[%s1889_s2 + $0x2e0] sm:$0xff]  ;;  %v746_v28 = vld [vmem:[%s1889_s2 + $0x2f0] sm:$0xff] }
  0x22   :  { %v963_v60 = vpack.c.bf16 %v727_v58, %v725_v57  ;;  %v985_v31 = vpack.c.bf16 %v746_v28, %v744_v27  ;;  %v748_v33 = vld [vmem:[%s1889_s2 + $0x300] sm:$0xff]  ;;  %v750_v34 = vld [vmem:[%s1889_s2 + $0x310] sm:$0xff]  ;;  %v767_v54 = vld [vmem:[%s1889_s2 + $0x398] sm:$0xff] }
  0x23   :  { %v989_v37 = vpack.c.bf16 %v750_v34, %v748_v33  ;;  %v752_v39 = vld [vmem:[%s1889_s2 + $0x320] sm:$0xff]  ;;  %v754_v40 = vld [vmem:[%s1889_s2 + $0x330] sm:$0xff]  ;;  %v1003_v56 = vpack.c.bf16 %v767_v54, %v765_v53  ;;  %v769_v59 = vld [vmem:[%s1889_s2 + $0x3a8] sm:$0xff] }
  0x24   :  { %922 = vmatpush1.bf16.msra.mxu1 %v921_v63  ;;  %v729_v63 = vld [vmem:[%s1889_s2 + $0x268] sm:$0xff]  ;;  %964 = vmatprep.subr.bf16.mxu0 %v963_v60  ;;  %v993_v43 = vpack.c.bf16 %v754_v40, %v752_v39  ;;  %v758_v46 = vld [vmem:[%s1889_s2 + $0x350] sm:$0xff]  ;;  %v760_v51 = vld [vmem:[%s1889_s2 + $0x360] sm:$0xff] }
  0x25   :  { %924 = vmatprep.subr.bf16.mxu1 %v923_v0  ;;  %v731_v0 = vld [vmem:[%s1889_s2 + $0x278] sm:$0xff]  ;;  %966 = vmatpush1.bf16.msra.mxu0 %v965_v1  ;;  %v762_v52 = vld [vmem:[%s1889_s2 + $0x370] sm:$0xff]  ;;  %v764_v57 = vld [vmem:[%s1889_s2 + $0x380] sm:$0xff] }
  0x26   :  { %v967_v2 = vpack.c.bf16 %v731_v0, %v729_v63  ;;  %v1001_v55 = vpack.c.bf16 %v762_v52, %v760_v51  ;;  %v766_v58 = vld [vmem:[%s1889_s2 + $0x390] sm:$0xff]  ;;  %v771_v60 = vld [vmem:[%s1889_s2 + $0x3b8] sm:$0xff]  ;;  %v768_v63 = vld [vmem:[%s1889_s2 + $0x3a0] sm:$0xff] }
  0x27   :  { %v1005_v61 = vpack.c.bf16 %v766_v58, %v764_v57  ;;  %v1007_v62 = vpack.c.bf16 %v771_v60, %v769_v59  ;;  %v770_v0 = vld [vmem:[%s1889_s2 + $0x3b0] sm:$0xff]  ;;  %v777_v10 = vld [vmem:[%s1889_s2 + $0x3e8] sm:$0xff]  ;;  %v789_v22 = vld [vmem:[%s1889_s2 + $0x438] sm:$0xff] }
  0x28   :  { %926 = vmatpush1.bf16.msra.mxu1 %v925_v5  ;;  %v733_v5 = vld [vmem:[%s1889_s2 + $0x288] sm:$0xff]  ;;  %968 = vmatprep.subr.bf16.mxu0 %v967_v2  ;;  %v1009_v1 = vpack.c.bf16 %v770_v0, %v768_v63  ;;  %v793_v28 = vld [vmem:[%s1889_s2 + $0x458] sm:$0xff] }
  0x29   :  { %928 = vmatprep.subr.bf16.mxu1 %v927_v6  ;;  %v735_v6 = vld [vmem:[%s1889_s2 + $0x298] sm:$0xff]  ;;  %970 = vmatpush1.bf16.msra.mxu0 %v969_v7  ;;  %v772_v7 = vld [vmem:[%s1889_s2 + $0x3c0] sm:$0xff]  ;;  %v783_v16 = vld [vmem:[%s1889_s2 + $0x408] sm:$0xff] }
  0x2a   :  { %v971_v8 = vpack.c.bf16 %v735_v6, %v733_v5  ;;  %v775_v5 = vld [vmem:[%s1889_s2 + $0x3d8] sm:$0xff]  ;;  %v787_v21 = vld [vmem:[%s1889_s2 + $0x428] sm:$0xff] }
  0x2b   :  { %v1011_v6 = vpack.c.bf16 %v775_v5, %v773_v4  ;;  %v791_v27 = vld [vmem:[%s1889_s2 + $0x448] sm:$0xff]  ;;  %v797_v34 = vld [vmem:[%s1889_s2 + $0x478] sm:$0xff]  ;;  %v816_v4 = vld [vmem:[%s1889_s2 + $0x510] sm:$0xff] }
  0x2c   :  { %930 = vmatpush1.bf16.msra.mxu1 %v929_v11  ;;  %v737_v11 = vld [vmem:[%s1889_s2 + $0x2a8] sm:$0xff]  ;;  %972 = vmatprep.subr.bf16.mxu0 %v971_v8  ;;  %v774_v8 = vld [vmem:[%s1889_s2 + $0x3d0] sm:$0xff]  ;;  %v801_v40 = vld [vmem:[%s1889_s2 + $0x498] sm:$0xff] }
  0x2d   :  { %932 = vmatprep.subr.bf16.mxu1 %v931_v12  ;;  %v739_v12 = vld [vmem:[%s1889_s2 + $0x2b8] sm:$0xff]  ;;  %974 = vmatpush1.bf16.msra.mxu0 %v973_v13  ;;  %v1013_v9 = vpack.c.bf16 %v774_v8, %v772_v7  ;;  %v776_v13 = vld [vmem:[%s1889_s2 + $0x3e0] sm:$0xff]  ;;  %v795_v33 = vld [vmem:[%s1889_s2 + $0x468] sm:$0xff] }
  0x2e   :  { %v975_v14 = vpack.c.bf16 %v739_v12, %v737_v11  ;;  %v779_v11 = vld [vmem:[%s1889_s2 + $0x3f8] sm:$0xff]  ;;  %v799_v39 = vld [vmem:[%s1889_s2 + $0x488] sm:$0xff] }
  0x2f   :  { %v1015_v12 = vpack.c.bf16 %v779_v11, %v777_v10  ;;  %v807_v51 = vld [vmem:[%s1889_s2 + $0x4c8] sm:$0xff]  ;;  %v809_v52 = vld [vmem:[%s1889_s2 + $0x4d8] sm:$0xff]  ;;  %v820_v10 = vld [vmem:[%s1889_s2 + $0x530] sm:$0xff] }
  0x30   :  { %934 = vmatpush1.bf16.msra.mxu1 %v933_v17  ;;  %v741_v17 = vld [vmem:[%s1889_s2 + $0x2c8] sm:$0xff]  ;;  %976 = vmatprep.subr.bf16.mxu0 %v975_v14  ;;  %v778_v14 = vld [vmem:[%s1889_s2 + $0x3f0] sm:$0xff]  ;;  %v1043_v54 = vpack.c.bf16 %v809_v52, %v807_v51  ;;  %v813_v58 = vld [vmem:[%s1889_s2 + $0x4f8] sm:$0xff] }
  0x31   :  { %936 = vmatprep.subr.bf16.mxu1 %v935_v18  ;;  %v743_v18 = vld [vmem:[%s1889_s2 + $0x2d8] sm:$0xff]  ;;  %978 = vmatpush1.bf16.msra.mxu0 %v977_v19  ;;  %v1017_v15 = vpack.c.bf16 %v778_v14, %v776_v13  ;;  %v811_v57 = vld [vmem:[%s1889_s2 + $0x4e8] sm:$0xff] }
  0x32   :  { %v979_v20 = vpack.c.bf16 %v743_v18, %v741_v17  ;;  %v785_v17 = vld [vmem:[%s1889_s2 + $0x418] sm:$0xff]  ;;  %v782_v18 = vld [vmem:[%s1889_s2 + $0x400] sm:$0xff]  ;;  %v1047_v60 = vpack.c.bf16 %v813_v58, %v811_v57  ;;  %v815_v63 = vld [vmem:[%s1889_s2 + $0x508] sm:$0xff] }
  0x33   :  { %v1019_v19 = vpack.c.bf16 %v785_v17, %v783_v16  ;;  %v817_v0 = vld [vmem:[%s1889_s2 + $0x518] sm:$0xff]  ;;  %v819_v5 = vld [vmem:[%s1889_s2 + $0x528] sm:$0xff]  ;;  %v824_v16 = vld [vmem:[%s1889_s2 + $0x550] sm:$0xff] }
  0x34   :  { %938 = vmatpush1.bf16.msra.mxu1 %v937_v23  ;;  %v745_v23 = vld [vmem:[%s1889_s2 + $0x2e8] sm:$0xff]  ;;  %980 = vmatprep.subr.bf16.mxu0 %v979_v20  ;;  %v784_v20 = vld [vmem:[%s1889_s2 + $0x410] sm:$0xff]  ;;  %v838_v57 = vld [vmem:[%s1889_s2 + $0x5c0] sm:$0xff] }
  0x35   :  { %940 = vmatprep.subr.bf16.mxu1 %v939_v24  ;;  %v747_v24 = vld [vmem:[%s1889_s2 + $0x2f8] sm:$0xff]  ;;  %982 = vmatpush1.bf16.msra.mxu0 %v981_v25  ;;  %v786_v25 = vld [vmem:[%s1889_s2 + $0x420] sm:$0xff]  ;;  %v823_v11 = vld [vmem:[%s1889_s2 + $0x548] sm:$0xff] }
  0x36   :  { %v983_v26 = vpack.c.bf16 %v747_v24, %v745_v23  ;;  %v1021_v23 = vpack.c.bf16 %v784_v20, %v782_v18  ;;  %v1023_v24 = vpack.c.bf16 %v789_v22, %v787_v21  ;;  %v827_v17 = vld [vmem:[%s1889_s2 + $0x568] sm:$0xff]  ;;  %v829_v18 = vld [vmem:[%s1889_s2 + $0x578] sm:$0xff]  ;;  %v826_v21 = vld [vmem:[%s1889_s2 + $0x560] sm:$0xff] }
  0x37   :  { %v1063_v20 = vpack.c.bf16 %v829_v18, %v827_v17  ;;  %v828_v22 = vld [vmem:[%s1889_s2 + $0x570] sm:$0xff]  ;;  %v612_v17 = vld [vmem:[%s1893_s5 + $0x20] sm:$0xff]  ;;  %v613_v18 = vld [vmem:[%s1893_s5 + $0x28] sm:$0xff] }
  0x38   :  { %942 = vmatpush1.bf16.msra.mxu1 %v941_v29  ;;  %v749_v29 = vld [vmem:[%s1889_s2 + $0x308] sm:$0xff]  ;;  %984 = vmatprep.subr.bf16.mxu0 %v983_v26  ;;  %v788_v26 = vld [vmem:[%s1889_s2 + $0x430] sm:$0xff] }
  0x39   :  { %944 = vmatprep.subr.bf16.mxu1 %v943_v30  ;;  %v751_v30 = vld [vmem:[%s1889_s2 + $0x318] sm:$0xff]  ;;  %986 = vmatpush1.bf16.msra.mxu0 %v985_v31  ;;  %v790_v31 = vld [vmem:[%s1889_s2 + $0x440] sm:$0xff]  ;;  %v840_v58 = vld [vmem:[%s1889_s2 + $0x5d0] sm:$0xff] }
  0x3a   :  { %v987_v32 = vpack.c.bf16 %v751_v30, %v749_v29  ;;  %v1025_v29 = vpack.c.bf16 %v788_v26, %v786_v25  ;;  %v1027_v30 = vpack.c.bf16 %v793_v28, %v791_v27  ;;  %v1065_v25 = vpack.c.bf16 %v828_v22, %v826_v21  ;;  %v830_v27 = vld [vmem:[%s1889_s2 + $0x580] sm:$0xff]  ;;  %v832_v28 = vld [vmem:[%s1889_s2 + $0x590] sm:$0xff] }
  0x3b   :  { %v1093_v21 = vpack.c.bf16 %v613_v18, %v612_v17 }
  0x3c   :  { %946 = vmatpush1.bf16.msra.mxu1 %v945_v35  ;;  %v753_v35 = vld [vmem:[%s1889_s2 + $0x328] sm:$0xff]  ;;  %988 = vmatprep.subr.bf16.mxu0 %v987_v32  ;;  %v792_v32 = vld [vmem:[%s1889_s2 + $0x450] sm:$0xff] }
  0x3d   :  { %948 = vmatprep.subr.bf16.mxu1 %v947_v36  ;;  %v755_v36 = vld [vmem:[%s1889_s2 + $0x338] sm:$0xff]  ;;  %990 = vmatpush1.bf16.msra.mxu0 %v989_v37  ;;  %v794_v37 = vld [vmem:[%s1889_s2 + $0x460] sm:$0xff] }
  0x3e   :  { %v991_v38 = vpack.c.bf16 %v755_v36, %v753_v35  ;;  %v1029_v35 = vpack.c.bf16 %v792_v32, %v790_v31  ;;  %v1031_v36 = vpack.c.bf16 %v797_v34, %v795_v33  ;;  %v1069_v31 = vpack.c.bf16 %v832_v28, %v830_v27  ;;  %v834_v33 = vld [vmem:[%s1889_s2 + $0x5a0] sm:$0xff]  ;;  %v836_v34 = vld [vmem:[%s1889_s2 + $0x5b0] sm:$0xff] }
  0x40   :  { %950 = vmatpush1.bf16.msra.mxu1 %v949_v41  ;;  %v757_v41 = vld [vmem:[%s1889_s2 + $0x348] sm:$0xff]  ;;  %992 = vmatprep.subr.bf16.mxu0 %v991_v38  ;;  %v796_v38 = vld [vmem:[%s1889_s2 + $0x470] sm:$0xff] }
  0x41   :  { %952 = vmatprep.subr.bf16.mxu1 %v951_v42  ;;  %v759_v42 = vld [vmem:[%s1889_s2 + $0x358] sm:$0xff]  ;;  %994 = vmatpush1.bf16.msra.mxu0 %v993_v43  ;;  %v798_v43 = vld [vmem:[%s1889_s2 + $0x480] sm:$0xff] }
  0x42   :  { %v995_v44 = vpack.c.bf16 %v759_v42, %v757_v41  ;;  %v1033_v41 = vpack.c.bf16 %v796_v38, %v794_v37  ;;  %v1035_v42 = vpack.c.bf16 %v801_v40, %v799_v39  ;;  %v242_v39 = vld [vmem:[%s1891_s3] ss:$4 sm:$0x3] }
  0x44   :  { %954 = vmatpush1.bf16.msra.mxu1 %v953_v45  ;;  %v756_v45 = vld [vmem:[%s1889_s2 + $0x340] sm:$0xff]  ;;  %996 = vmatprep.subr.bf16.mxu0 %v995_v44  ;;  %v800_v44 = vld [vmem:[%s1889_s2 + $0x490] sm:$0xff] }
  0x45   :  { %v997_v49 = vpack.c.bf16 %v758_v46, %v756_v45  ;;  %1020 = vmatprep.subr.bf16.mxu1 %v1019_v19  ;;  %v803_v45 = vld [vmem:[%s1889_s2 + $0x4a8] sm:$0xff]  ;;  %v805_v46 = vld [vmem:[%s1889_s2 + $0x4b8] sm:$0xff]  ;;  %v1037_v47 = vpack.c.bf16 %v800_v44, %v798_v43 }
  0x46   :  { %v1039_v48 = vpack.c.bf16 %v805_v46, %v803_v45 }
  0x47   :  { %998 = vmatpush1.bf16.msra.mxu0 %v997_v49  ;;  %v802_v49 = vld [vmem:[%s1889_s2 + $0x4a0] sm:$0xff] }
  0x48   :  { %1000 = vmatprep.subr.bf16.mxu0 %v999_v50  ;;  %v804_v50 = vld [vmem:[%s1889_s2 + $0x4b0] sm:$0xff] }
  0x49   :  { %v1041_v53 = vpack.c.bf16 %v804_v50, %v802_v49 }
  0x4b   :  { %1002 = vmatpush1.bf16.msra.mxu0 %v1001_v55  ;;  %v806_v55 = vld [vmem:[%s1889_s2 + $0x4c0] sm:$0xff] }
  0x4c   :  { %1004 = vmatprep.subr.bf16.mxu0 %v1003_v56  ;;  %v808_v56 = vld [vmem:[%s1889_s2 + $0x4d0] sm:$0xff] }
  0x4d   :  { %v1045_v59 = vpack.c.bf16 %v808_v56, %v806_v55  ;;  %v841_v55 = vld [vmem:[%s1889_s2 + $0x5d8] sm:$0xff] }
  0x4f   :  { %1006 = vmatpush1.bf16.msra.mxu0 %v1005_v61  ;;  %v810_v61 = vld [vmem:[%s1889_s2 + $0x4e0] sm:$0xff] }
  0x50   :  { %1008 = vmatprep.subr.bf16.mxu0 %v1007_v62  ;;  %v812_v62 = vld [vmem:[%s1889_s2 + $0x4f0] sm:$0xff] }
  0x53   :  { %1010 = vmatpush1.bf16.msra.mxu0 %v1009_v1  ;;  %v1049_v1 = vpack.c.bf16 %v812_v62, %v810_v61  ;;  %v845_v61 = vld [vmem:[%s1889_s2 + $0x5f8] sm:$0xff] }
  0x54   :  { %1012 = vmatprep.subr.bf16.mxu0 %v1011_v6  ;;  %v821_v6 = vld [vmem:[%s1889_s2 + $0x538] sm:$0xff] }
  0x55   :  { %v1055_v8 = vpack.c.bf16 %v821_v6, %v819_v5  ;;  %v609_v6 = vld [vmem:[%s1893_s5 + $0x8] sm:$0xff] }
  0x57   :  { %1014 = vmatpush1.bf16.msra.mxu0 %v1013_v9  ;;  %v818_v9 = vld [vmem:[%s1889_s2 + $0x520] sm:$0xff] }
  0x58   :  { %1016 = vmatprep.subr.bf16.mxu0 %v1015_v12  ;;  %v825_v12 = vld [vmem:[%s1889_s2 + $0x558] sm:$0xff]  ;;  %v1057_v13 = vpack.c.bf16 %v820_v10, %v818_v9 }
  0x59   :  { %v1059_v14 = vpack.c.bf16 %v825_v12, %v823_v11  ;;  %v610_v11 = vld [vmem:[%s1893_s5 + $0x10] sm:$0xff]  ;;  %v611_v12 = vld [vmem:[%s1893_s5 + $0x18] sm:$0xff] }
  0x5b   :  { %1018 = vmatpush1.bf16.msra.mxu0 %v1017_v15  ;;  %v822_v15 = vld [vmem:[%s1889_s2 + $0x540] sm:$0xff] }
  0x5c   :  { %v1061_v19 = vpack.c.bf16 %v824_v16, %v822_v15  ;;  %v1089_v15 = vpack.c.bf16 %v611_v12, %v610_v11 }
  0xdf   :  { %v102_v2 = vpop.f32.mrb[0].mxu0 }
  0xe0   :  { %v104_v3 = vpop.f32.mrb[1].mxu0 }
  0xe1   :  { %235 = vmatprep.mubr.f32.mxu1 %v104_v3  ;;  %v814_v3 = vld [vmem:[%s1889_s2 + $0x500] sm:$0xff] }
  0xe2   :  { %236 = vmatmul.mubr.f32.vlgmr.msra.gmra.mrb[0].mxu1 %v102_v2  ;;  %v1051_v2 = vpack.c.bf16 %v817_v0, %v815_v63  ;;  %v1053_v7 = vpack.c.bf16 %v816_v4, %v814_v3  ;;  %v842_v63 = vld [vmem:[%s1889_s2 + $0x5e0] sm:$0xff]  ;;  %v844_v0 = vld [vmem:[%s1889_s2 + $0x5f0] sm:$0xff]  ;;  %v625_v3 = vld [vmem:[%s1893_s5 + $0x88] sm:$0xff] }
  0xe3   :  { %1022 = vmatpush1.bf16.msra.mxu1 %v1021_v23  ;;  %v831_v23 = vld [vmem:[%s1889_s2 + $0x588] sm:$0xff]  ;;  %v608_v4 = vld [vmem:[%s1893_s5] sm:$0xff] }
  0xe4   :  { %1024 = vmatprep.subr.bf16.mxu1 %v1023_v24  ;;  %v833_v24 = vld [vmem:[%s1889_s2 + $0x598] sm:$0xff]  ;;  %v1085_v9 = vpack.c.bf16 %v609_v6, %v608_v4 }
  0xe5   :  { %v1067_v26 = vpack.c.bf16 %v833_v24, %v831_v23  ;;  %v614_v23 = vld [vmem:[%s1893_s5 + $0x30] sm:$0xff]  ;;  %v615_v24 = vld [vmem:[%s1893_s5 + $0x38] sm:$0xff] }
  0xe6   :  { %v1097_v27 = vpack.c.bf16 %v615_v24, %v614_v23 }
  0xe7   :  { %1026 = vmatpush1.bf16.msra.mxu1 %v1025_v29  ;;  %v835_v29 = vld [vmem:[%s1889_s2 + $0x5a8] sm:$0xff] }
  0xe8   :  { %1028 = vmatprep.subr.bf16.mxu1 %v1027_v30  ;;  %v837_v30 = vld [vmem:[%s1889_s2 + $0x5b8] sm:$0xff] }
  0xe9   :  { %v1071_v32 = vpack.c.bf16 %v837_v30, %v835_v29  ;;  %v616_v29 = vld [vmem:[%s1893_s5 + $0x40] sm:$0xff]  ;;  %v617_v30 = vld [vmem:[%s1893_s5 + $0x48] sm:$0xff] }
  0xeb   :  { %1030 = vmatpush1.bf16.msra.mxu1 %v1029_v35  ;;  %v1073_v35 = vpack.c.bf16 %v836_v34, %v834_v33  ;;  %v1101_v33 = vpack.c.bf16 %v617_v30, %v616_v29 }
  0xec   :  { %1032 = vmatprep.subr.bf16.mxu1 %v1031_v36  ;;  %v244_v36 = vlaneseq }
  0xee   :  { %v245_v37 = vshrl.u32 %v244_v36, 7  ;;  %v619_v36 = vld [vmem:[%s1893_s5 + $0x58] sm:$0xff] }
  0xef   :  { %1034 = vmatpush1.bf16.msra.mxu1 %v1033_v41  ;;  %v256_v41 = vld [vmem:[%s1892_s4] ss:$4 sm:$0x3] }
  0xf0   :  { %1036 = vmatprep.subr.bf16.mxu1 %v1035_v42  ;;  %v1731_v38 = vsub.s32 0, %v245_v37  ;;  %v1736_v40 = vsub.s32 1, %v245_v37 }
  0xf2   :  { %v247_v42 = vrot.slane %v242_v39, %v1731_v38  ;;  %v251_v43 = vrot.slane %v242_v39, %v1736_v40  ;;  %v261_v44 = vrot.slane %v256_v41, %v1731_v38  ;;  %v265_v46 = vrot.slane %v256_v41, %v1736_v40  ;;  %v780_v39 = vld [vmem:[%s1891_s3 + $0x1] ss:$4 sm:$0x3] }
  0xf3   :  { %1038 = vmatpush1.bf16.msra.mxu1 %v1037_v47  ;;  %v781_v41 = vld [vmem:[%s1892_s4 + $0x1] ss:$4 sm:$0x3] }
  0xf4   :  { %1040 = vmatprep.subr.bf16.mxu1 %v1039_v48 }
  0xf7   :  { %1042 = vmatpush1.bf16.msra.mxu1 %v1041_v53 }
  0xf8   :  { %1044 = vmatprep.subr.bf16.mxu1 %v1043_v54  ;;  %v839_v54 = vld [vmem:[%s1889_s2 + $0x5c8] sm:$0xff] }
  0xf9   :  { %v1075_v56 = vpack.c.bf16 %v841_v55, %v839_v54  ;;  %v636_v54 = vld [vmem:[%s1893_s5 + $0xe0] sm:$0xff]  ;;  %v637_v55 = vld [vmem:[%s1893_s5 + $0xe8] sm:$0xff] }
  0xfb   :  { %1046 = vmatpush1.bf16.msra.mxu1 %v1045_v59  ;;  %v1077_v59 = vpack.c.bf16 %v840_v58, %v838_v57  ;;  %v620_v57 = vld [vmem:[%s1893_s5 + $0x60] sm:$0xff]  ;;  %v621_v58 = vld [vmem:[%s1893_s5 + $0x68] sm:$0xff] }
  0xfc   :  { %1048 = vmatprep.subr.bf16.mxu1 %v1047_v60  ;;  %v843_v60 = vld [vmem:[%s1889_s2 + $0x5e8] sm:$0xff] }
  0xfd   :  { %v1079_v62 = vpack.c.bf16 %v845_v61, %v843_v60  ;;  %v638_v60 = vld [vmem:[%s1893_s5 + $0xf0] sm:$0xff]  ;;  %v639_v61 = vld [vmem:[%s1893_s5 + $0xf8] sm:$0xff] }
  0xff   :  { %1050 = vmatpush1.bf16.msra.mxu1 %v1049_v1  ;;  %v1081_v1 = vpack.c.bf16 %v844_v0, %v842_v63  ;;  %v622_v63 = vld [vmem:[%s1893_s5 + $0x70] sm:$0xff]  ;;  %v623_v0 = vld [vmem:[%s1893_s5 + $0x78] sm:$0xff] }
 0x100   :  { %1052 = vmatprep.subr.bf16.mxu1 %v1051_v2  ;;  %v624_v2 = vld [vmem:[%s1893_s5 + $0x80] sm:$0xff] }
 0x101   :  { %v1083_v5 = vpack.c.bf16 %v625_v3, %v624_v2  ;;  %v846_v2 = vld [vmem:[%s1891_s3 + $0x2] ss:$4 sm:$0x3] }
 0x102   :  { %v847_v3 = vld [vmem:[%s1892_s4 + $0x2] ss:$4 sm:$0x3]  ;;  %v582_v4 = vrot.slane %v846_v2, %v1731_v38 }
 0x103   :  { %1054 = vmatpush1.bf16.msra.mxu1 %v1053_v7  ;;  %v626_v7 = vld [vmem:[%s1893_s5 + $0x90] sm:$0xff]  ;;  %1084 = vmatprep.subr.bf16.mxu0 %v1083_v5  ;;  %v586_v5 = vrot.slane %v846_v2, %v1736_v40  ;;  %v597_v6 = vrot.slane %v847_v3, %v1731_v38 }
 0x104   :  { %1056 = vmatprep.subr.bf16.mxu1 %v1055_v8  ;;  %v627_v8 = vld [vmem:[%s1893_s5 + $0x98] sm:$0xff] }
 0x105   :  { %v1087_v10 = vpack.c.bf16 %v627_v8, %v626_v7  ;;  %v601_v8 = vrot.slane %v847_v3, %v1736_v40 }
 0x107   :  { %1058 = vmatpush1.bf16.msra.mxu1 %v1057_v13  ;;  %v628_v13 = vld [vmem:[%s1893_s5 + $0xa0] sm:$0xff] }
 0x108   :  { %1060 = vmatprep.subr.bf16.mxu1 %v1059_v14  ;;  %v629_v14 = vld [vmem:[%s1893_s5 + $0xa8] sm:$0xff] }
 0x109   :  { %v1091_v16 = vpack.c.bf16 %v629_v14, %v628_v13 }
 0x10b   :  { %1062 = vmatpush1.bf16.msra.mxu1 %v1061_v19  ;;  %v630_v19 = vld [vmem:[%s1893_s5 + $0xb0] sm:$0xff] }
 0x10c   :  { %1064 = vmatprep.subr.bf16.mxu1 %v1063_v20  ;;  %v631_v20 = vld [vmem:[%s1893_s5 + $0xb8] sm:$0xff] }
 0x10d   :  { %v1095_v22 = vpack.c.bf16 %v631_v20, %v630_v19 }
 0x10f   :  { %1066 = vmatpush1.bf16.msra.mxu1 %v1065_v25  ;;  %v632_v25 = vld [vmem:[%s1893_s5 + $0xc0] sm:$0xff] }
 0x110   :  { %1068 = vmatprep.subr.bf16.mxu1 %v1067_v26  ;;  %v633_v26 = vld [vmem:[%s1893_s5 + $0xc8] sm:$0xff] }
 0x111   :  { %v1099_v28 = vpack.c.bf16 %v633_v26, %v632_v25 }
 0x113   :  { %1070 = vmatpush1.bf16.msra.mxu1 %v1069_v31  ;;  %v634_v31 = vld [vmem:[%s1893_s5 + $0xd0] sm:$0xff] }
 0x114   :  { %1072 = vmatprep.subr.bf16.mxu1 %v1071_v32  ;;  %v635_v32 = vld [vmem:[%s1893_s5 + $0xd8] sm:$0xff] }
 0x115   :  { %v1103_v34 = vpack.c.bf16 %v635_v32, %v634_v31 }
 0x117   :  { %1074 = vmatpush1.bf16.msra.mxu1 %v1073_v35  ;;  %v618_v35 = vld [vmem:[%s1893_s5 + $0x50] sm:$0xff] }
 0x118   :  { %1076 = vmatprep.subr.bf16.mxu1 %v1075_v56  ;;  %v1105_v37 = vpack.c.bf16 %v619_v36, %v618_v35  ;;  %v1107_v56 = vpack.c.bf16 %v637_v55, %v636_v54 }
 0x11b   :  { %1078 = vmatpush1.bf16.msra.mxu1 %v1077_v59  ;;  %v1109_v59 = vpack.c.bf16 %v621_v58, %v620_v57 }
 0x11c   :  { %1080 = vmatprep.subr.bf16.mxu1 %v1079_v62  ;;  %v1111_v62 = vpack.c.bf16 %v639_v61, %v638_v60 }
 0x11f   :  { %1082 = vmatpush1.bf16.msra.mxu1 %v1081_v1  ;;  %v1113_v1 = vpack.c.bf16 %v623_v0, %v622_v63 }
 0x1b5   :  { %v237_v45 = vpop.f32.mrb[0].mxu1 }
 0x1b6   :  { %v254_v47 = vmul.f32 %v247_v42, %v237_v45  ;;  %v239_v48 = vpop.f32.mrb[1].mxu1  ;;  %v414_v42 = vrot.slane %v780_v39, %v1731_v38 }
 0x1b7   :  { %v255_v49 = vmul.f32 %v251_v43, %v239_v48  ;;  %v418_v43 = vrot.slane %v780_v39, %v1736_v40 }
 0x1b8   :  { %v268_v50 = vadd.f32 %v261_v44, %v254_v47  ;;  %v429_v44 = vrot.slane %v781_v41, %v1731_v38 }
 0x1b9   :  { %v269_v51 = vadd.f32 %v265_v46, %v255_v49  ;;  %v433_v46 = vrot.slane %v781_v41, %v1736_v40 }
 0x1ba   :  { %v270_v53 = vmax.f32 %v268_v50, 0.0 }
 0x1bb   :  { %v271_v52 = vmax.f32 %v269_v51, 0.0 }
 0x1bd   :  { %401 = vmatprep.mubr.f32.mxu0 %v271_v52 }
 0x1be   :  { %402 = vmatmul.mubr.f32.vlgmr.msra.gmra.mrb[2].mxu0 %v270_v53 }
 0x1bf   :  { %1086 = vmatpush3.bf16.msra.mxu0 %v1085_v9 }
 0x1c0   :  { %1088 = vmatprep.subr.bf16.mxu0 %v1087_v10 }
 0x1c3   :  { %1090 = vmatpush3.bf16.msra.mxu0 %v1089_v15 }
 0x1c4   :  { %1092 = vmatprep.subr.bf16.mxu0 %v1091_v16 }
 0x1c7   :  { %1094 = vmatpush3.bf16.msra.mxu0 %v1093_v21 }
 0x1c8   :  { %1096 = vmatprep.subr.bf16.mxu0 %v1095_v22 }
 0x1cb   :  { %1098 = vmatpush3.bf16.msra.mxu0 %v1097_v27 }
 0x1cc   :  { %1100 = vmatprep.subr.bf16.mxu0 %v1099_v28 }
 0x1cf   :  { %1102 = vmatpush3.bf16.msra.mxu0 %v1101_v33 }
 0x1d0   :  { %1104 = vmatprep.subr.bf16.mxu0 %v1103_v34 }
 0x1d3   :  { %1106 = vmatpush3.bf16.msra.mxu0 %v1105_v37 }
 0x1d4   :  { %1108 = vmatprep.subr.bf16.mxu0 %v1107_v56 }
 0x1d7   :  { %1110 = vmatpush3.bf16.msra.mxu0 %v1109_v59 }
 0x1d8   :  { %1112 = vmatprep.subr.bf16.mxu0 %v1111_v62 }
 0x1db   :  { %1114 = vmatpush3.bf16.msra.mxu0 %v1113_v1 }
 0x291   :  { %v403_v45 = vpop.f32.mrb[2].mxu0 }
 0x292   :  { %v421_v47 = vmul.f32 %v414_v42, %v403_v45  ;;  %v405_v48 = vpop.f32.mrb[3].mxu0 }
 0x293   :  { %v422_v49 = vmul.f32 %v418_v43, %v405_v48 }
 0x294   :  { %v436_v50 = vadd.f32 %v429_v44, %v421_v47 }
 0x295   :  { %v437_v51 = vadd.f32 %v433_v46, %v422_v49 }
 0x296   :  { %v438_v53 = vmax.f32 %v436_v50, 0.0 }
 0x297   :  { %v439_v52 = vmax.f32 %v437_v51, 0.0 }
 0x299   :  { %569 = vmatprep.mubr.f32.mxu1 %v439_v52 }
 0x29a   :  { %570 = vmatmul.mubr.f32.vlgmr.msra.gmra.mrb[2].mxu1 %v438_v53 }
 0x36d   :  { %v571_v7 = vpop.f32.mrb[2].mxu1 }
 0x36e   :  { %v589_v9 = vmul.f32 %v582_v4, %v571_v7  ;;  %v573_v10 = vpop.f32.mrb[3].mxu1 }
 0x36f   :  { %v590_v11 = vmul.f32 %v586_v5, %v573_v10 }
 0x370   :  { %v604_v12 = vadd.f32 %v597_v6, %v589_v9 }
 0x371   :  { %v605_v13 = vadd.f32 %v601_v8, %v590_v11 }
 0x372   :  { %v606_v15 = vmax.f32 %v604_v12, 0.0 }
 0x373   :  { %v607_v14 = vmax.f32 %v605_v13, 0.0 }
 0x375   :  { %704 = vmatprep.mubr.f32.mxu0 %v607_v14 }
 0x376   :  { %705 = vmatmul.mubr.f32.vlgmr.msra.gmra.mrb[4].mxu0 %v606_v15 }
 0x449   :  { %v880_v16 = vpop.f32.mrb[4].mxu0 }
 0x44a   :  { %v881_v17 = vpop.f32.mrb[5].mxu0 }
 0x44b   :  { %v882_v18 = vadd.f32 %v881_v17, %v880_v16 }
 0x44d   :  { %710 = vst [vmem:[%s1894_s6] sm:$0xff] %v882_v18 }

</bundles_post_ra>
